<compile_context>
chip_gen: v7x
topology: tpu7x:2x2x1
jax: 0.10.0
libtpu: 0.0.40
codegen_flags: <defaults>
</compile_context>

<pallas_src>
import jax
import jax.numpy as jnp
from jax.experimental import pallas as pl
from jax.experimental.pallas import tpu as pltpu


def _tpu_topology():
    """(tensorcores_per_chip, physical_vmem_bytes) with conservative fallbacks."""
    cores, vmem = 1, 64 << 20          # safe defaults (v7x has the smallest VMEM)
    try:
        info = pltpu.get_tpu_info()
        vmem = int(getattr(info, "vmem_capacity_bytes", vmem))
        for name in ("num_cores", "core_count", "num_tensorcores",
                     "tensorcore_count", "cores_per_chip"):
            v = getattr(info, name, None)
            if v:
                cores = int(v)
                break
    except Exception:                  # best-effort hardware probe only
        pass
    return cores, vmem


def _make_combo_kernel(C, ts, acc_rows, from_labels, single_log):
    """Per-tile statistics kernel.

    refs:    pred (B,C,ts,128); target: dense (B,C,ts,128) or labels (B,ts,128)
    outputs: inter/denom/bce partials, each (1,B,C)
    scratch: inter/denom/bce accumulators, each (B,C,acc_rows,128) f32
    """
    n_groups = ts // acc_rows

    def kernel(pred_ref, tgt_ref, inter_out, denom_out, bce_out,
               inter_acc, denom_acc, bce_acc):
        i = pl.program_id(1)

        # Fold the (ts, 128) tile down to acc_rows sublanes in registers
        # (pure VALU; vreg-aligned static slices), one group at a time so
        # live temporaries stay at (B, C, acc_rows, 128).
        inter_t = denom_t = bce_t = None
        for g in range(n_groups):
            rsl = slice(g * acc_rows, (g + 1) * acc_rows)
            p = pred_ref[:, :, rsl, :].astype(jnp.float32)     # (B,C,acc_rows,128)
            if from_labels:
                lab = tgt_ref[:, rsl, :]                       # (B,acc_rows,128) i32
                t = jnp.stack(
                    [(lab == c).astype(jnp.float32) for c in range(C)], axis=1)
            else:
                t = tgt_ref[:, :, rsl, :].astype(jnp.float32)

            if single_log:
                # Hard one-hot targets: one EUP log per element.
                sel = jnp.where(t > 0.5, p, 1.0 - p)
                bce_g = -jnp.maximum(jnp.log(sel), -100.0)
            else:
                # General / soft targets (torch BCELoss with its -100 log clamp).
                log_p = jnp.maximum(jnp.log(p), -100.0)
                log_q = jnp.maximum(jnp.log(1.0 - p), -100.0)
                bce_g = -(t * log_p + (1.0 - t) * log_q)

            inter_g = p * t
            denom_g = p + t
            if g == 0:
                inter_t, denom_t, bce_t = inter_g, denom_g, bce_g
            else:
                inter_t += inter_g
                denom_t += denom_g
                bce_t += bce_g

        @pl.when(i == 0)            # first step of this split: plain write
        def _():
            inter_acc[...] = inter_t
            denom_acc[...] = denom_t
            bce_acc[...] = bce_t

        @pl.when(i != 0)
        def _():
            inter_acc[...] += inter_t
            denom_acc[...] += denom_t
            bce_acc[...] += bce_t

        @pl.when(i == pl.num_programs(1) - 1)   # deferred XLU reduction
        def _():
            def _reduce(acc):                    # (B,C,acc_rows,128) -> (B,C)
                v = jnp.sum(acc[...], axis=-1)
                return jnp.sum(v, axis=-1)
            inter_out[0] = _reduce(inter_acc)
            denom_out[0] = _reduce(denom_acc)
            bce_out[0] = _reduce(bce_acc)

    return kernel


def combo_loss3(pred, true=None, weight=None, alpha=0.5, smooth=1e-6, *,
                labels=None, one_hot_targets=False, max_tile_rows=None):
    """pred: (B, C, H, W) probabilities (native dtype; bf16 OK).
    Target: dense `true` (B, C, H, W) (soft or one-hot), or an integer label
    map `labels` (B, H, W) for hard one-hot targets (~C x fewer target bytes).
    weight: per-class weights (C,).  Returns the scalar combo loss."""
    if weight is None:
        raise ValueError("weight is required")
    B, C, H, W = pred.shape
    w = jnp.asarray(weight, jnp.float32)
    assert w.shape[0] == C, "shape is not mapping"
    N = H * W
    assert N % 128 == 0, "spatial size must be a multiple of 128"
    # TODO(synk): mask the tail tile to support N % 128 != 0.
    rows = N // 128

    from_labels = labels is not None
    pred_r = pred.reshape(B, C, rows, 128)                 # native dtype, no cast
    pred_row_bytes = B * C * 128 * pred.dtype.itemsize
    if from_labels:
        assert labels.shape == (B, H, W)
        tgt = labels.astype(jnp.int32).reshape(B, rows, 128)
        tgt_row_bytes = B * 128 * 4
        # TODO(synk): an int8 label stream would cut target bytes another 4x.
    else:
        assert true is not None and true.shape == pred.shape
        tgt = true.reshape(B, C, rows, 128)                # native dtype, no cast
        tgt_row_bytes = B * C * 128 * true.dtype.itemsize

    cores, vmem_phys = _tpu_topology()
    vmem_cap = (vmem_phys * 3) // 4                        # leave compiler headroom

    def _vmem_need(ts):
        a_rows = 8 if ts % 8 == 0 else ts
        acc_bytes = 3 * B * C * a_rows * 128 * 4
        # 2 pipeline buffers per input block + accumulators + slack.
        return 2 * ts * (pred_row_bytes + tgt_row_bytes) + acc_bytes + (2 << 20)

    cands = [r for r in (256, 128, 64, 32, 16, 8) if rows % r == 0]
    if max_tile_rows is not None:
        cands = [r for r in cands if r <= max_tile_rows]
    cands = [r for r in cands if _vmem_need(r) <= (vmem_cap * 6) // 10]
    if cands:
        ts = cands[0]
    elif rows % 8 == 0:
        ts = 8
    else:
        ts = rows                    # full extent (legal even when < 8 sublanes)
    acc_rows = 8 if ts % 8 == 0 else ts
    num_tiles = rows // ts

    # Split the reduction across TensorCores only where a second core exists.
    n_split = 2 if (cores >= 2 and num_tiles >= 2 and num_tiles % 2 == 0) else 1
    tiles_per_split = num_tiles // n_split
    if n_split > 1:
        dim_sem = (pltpu.CORE_PARALLEL, pltpu.ARBITRARY)
    else:
        dim_sem = ("arbitrary", "arbitrary")

    vmem_limit = int(min(vmem_cap, max(2 * _vmem_need(ts), 16 << 20)))

    def data_map(s, i):
        return (0, 0, s * tiles_per_split + i, 0)

    def label_map(s, i):
        return (0, s * tiles_per_split + i, 0)

    in_specs = [pl.BlockSpec((B, C, ts, 128), data_map),
                pl.BlockSpec((B, ts, 128), label_map) if from_labels
                else pl.BlockSpec((B, C, ts, 128), data_map)]

    stat = jax.ShapeDtypeStruct((n_split, B, C), jnp.float32)
    kernel = _make_combo_kernel(C, ts, acc_rows, from_labels,
                                single_log=from_labels or one_hot_targets)

    inter, denom, bce = pl.pallas_call(
        kernel,
        out_shape=(stat, stat, stat),
        grid_spec=pltpu.PrefetchScalarGridSpec(
            num_scalar_prefetch=0,
            grid=(n_split, tiles_per_split),
            in_specs=in_specs,
            out_specs=[pl.BlockSpec((1, B, C), lambda s, i: (s, 0, 0))
                       for _ in range(3)],
            scratch_shapes=[pltpu.VMEM((B, C, acc_rows, 128), jnp.float32)
                            for _ in range(3)]),
        compiler_params=pltpu.CompilerParams(
            dimension_semantics=dim_sem,
            vmem_limit_bytes=vmem_limit),
    )(pred_r, tgt)

    # Tiny (n_split, B, C) partial combine + weighted scalar epilogue in JAX.
    inter = jnp.sum(inter, axis=0)
    denom = jnp.sum(denom, axis=0)
    bce = jnp.sum(bce, axis=0)

    wn = w / jnp.sum(w)
    dc = jnp.sum(wn[None, :] *
                 (1.0 - (2.0 * inter + smooth) / (denom + smooth))) / B
    ce = jnp.sum(wn[None, :] * bce) / (B * N)
    return (1.0 - alpha) * dc + alpha * ce


def combo_loss3_ref(pred, true, weight, alpha=0.5, smooth=1e-6):
    """Pure-JAX reference mirroring the PyTorch ComboLoss3 module."""
    B, C = pred.shape[:2]
    p = pred.reshape(B, C, -1).astype(jnp.float32)
    t = true.reshape(B, C, -1).astype(jnp.float32)
    w = jnp.asarray(weight, jnp.float32)
    wn = w / jnp.sum(w)

    inter = jnp.sum(p * t, axis=2)
    denom = jnp.sum(p, axis=2) + jnp.sum(t, axis=2)
    dc = jnp.sum(wn[None, :] * (1.0 - (2.0 * inter + smooth) / (denom + smooth))) / B

    log_p = jnp.maximum(jnp.log(p), -100.0)
    log_q = jnp.maximum(jnp.log(1.0 - p), -100.0)
    bce = -(t * log_p + (1.0 - t) * log_q)
    ce = jnp.sum(wn * jnp.mean(bce, axis=(0, 2)))
    return (1.0 - alpha) * dc + alpha * ce


if __name__ == "__main__":
    B, C, H, W = 2, 4, 16, 16
    alpha = 0.5
    weight = jnp.array([1.0, 2.0, 0.5, 1.5], dtype=jnp.float32)

    key = jax.random.PRNGKey(0)
    kp, kl = jax.random.split(key)
    # pred must be probabilities (BCE input); keep away from {0, 1}.
    pred = jax.random.uniform(kp, (B, C, H, W), jnp.float32,
                              minval=0.02, maxval=0.98)
    labels = jax.random.randint(kl, (B, H, W), 0, C)
    true = jax.nn.one_hot(labels, C, axis=1, dtype=jnp.float32)

    ref = jax.block_until_ready(combo_loss3_ref(pred, true, weight, alpha=alpha))

    # 1) Dense-target path (general / soft targets; two-log BCE).
    out = jax.block_until_ready(combo_loss3(pred, true, weight, alpha=alpha))
    assert jnp.allclose(out, ref, rtol=2e-5, atol=1e-6), (out, ref)

    # 2) Label-map path (hard one-hot targets; ~C x fewer target bytes, 1 log).
    out = jax.block_until_ready(combo_loss3(pred, weight=weight, alpha=alpha,
                                            labels=labels))
    assert jnp.allclose(out, ref, rtol=2e-5, atol=1e-6), (out, ref)

    # 3) bf16 prediction stream (widened to f32 inside the kernel only).
    pred_bf16 = pred.astype(jnp.bfloat16)
    ref_bf16 = jax.block_until_ready(
        combo_loss3_ref(pred_bf16, true, weight, alpha=alpha))
    out = jax.block_until_ready(combo_loss3(pred_bf16, weight=weight,
                                            alpha=alpha, labels=labels))
    assert jnp.allclose(out, ref_bf16, rtol=1e-4, atol=1e-5), (out, ref_bf16)

    # 4) Larger spatial extent: exercises the in-register sublane folding
    #    (ts > 8) and, with max_tile_rows, the multi-step grid reduction.
    kp2, kl2 = jax.random.split(jax.random.PRNGKey(1))
    H2 = W2 = 64
    pred2 = jax.random.uniform(kp2, (B, C, H2, W2), jnp.float32,
                               minval=0.02, maxval=0.98)
    labels2 = jax.random.randint(kl2, (B, H2, W2), 0, C)
    true2 = jax.nn.one_hot(labels2, C, axis=1, dtype=jnp.float32)
    ref2 = jax.block_until_ready(combo_loss3_ref(pred2, true2, weight, alpha=alpha))

    out = jax.block_until_ready(
        combo_loss3(pred2, true2, weight, alpha=alpha, one_hot_targets=True))
    assert jnp.allclose(out, ref2, rtol=1e-4, atol=1e-5), (out, ref2)

    out = jax.block_until_ready(
        combo_loss3(pred2, weight=weight, alpha=alpha, labels=labels2,
                    max_tile_rows=8))
    assert jnp.allclose(out, ref2, rtol=1e-4, atol=1e-5), (out, ref2)

    print("KERNEL_OK")
</pallas_src>

<mosaic_0001>
module attributes {stable_mosaic.version = 11 : i64} {
  func.func @kernel(%arg0: i32, %arg1: i32, %arg2: memref<2x4x2x128xf32, #tpu.memory_space<vmem>>, %arg3: memref<2x4x2x128xf32, #tpu.memory_space<vmem>>, %arg4: memref<1x2x4xf32, #tpu.memory_space<vmem>>, %arg5: memref<1x2x4xf32, #tpu.memory_space<vmem>>, %arg6: memref<1x2x4xf32, #tpu.memory_space<vmem>>, %arg7: memref<2x4x2x128xf32, #tpu.memory_space<vmem>>, %arg8: memref<2x4x2x128xf32, #tpu.memory_space<vmem>>, %arg9: memref<2x4x2x128xf32, #tpu.memory_space<vmem>>) attributes {dimension_semantics = [#tpu.dimension_semantics<arbitrary>, #tpu.dimension_semantics<arbitrary>], iteration_bounds = array<i64: 1, 1>, scalar_prefetch = 0 : i64, scratch_operands = 3 : i64, tpu.core_type = #tpu.core_type<tc>, window_params = [{transform_indices = @transform_0, window_bounds = array<i64: 2, 4, 2, 128>}, {transform_indices = @transform_1, window_bounds = array<i64: 2, 4, 2, 128>}, {transform_indices = @transform_2, window_bounds = array<i64: 1, 2, 4>}, {transform_indices = @transform_3, window_bounds = array<i64: 1, 2, 4>}, {transform_indices = @transform_4, window_bounds = array<i64: 1, 2, 4>}]} {
    %c0 = arith.constant 0 : index
    %c0_0 = arith.constant 0 : index
    %c0_1 = arith.constant 0 : index
    %c0_2 = arith.constant 0 : index
    %0 = vector.load %arg2[%c0, %c0_0, %c0_1, %c0_2] : memref<2x4x2x128xf32, #tpu.memory_space<vmem>>, vector<2x4x2x128xf32>
    %c0_3 = arith.constant 0 : index
    %c0_4 = arith.constant 0 : index
    %c0_5 = arith.constant 0 : index
    %c0_6 = arith.constant 0 : index
    %1 = vector.load %arg3[%c0_3, %c0_4, %c0_5, %c0_6] : memref<2x4x2x128xf32, #tpu.memory_space<vmem>>, vector<2x4x2x128xf32>
    %2 = math.log %0 : vector<2x4x2x128xf32>
    %cst = arith.constant -1.000000e+02 : f32
    %3 = vector.broadcast %cst : f32 to vector<2x4x2x128xf32>
    %4 = arith.maximumf %2, %3 : vector<2x4x2x128xf32>
    %cst_7 = arith.constant 1.000000e+00 : f32
    %5 = vector.broadcast %cst_7 : f32 to vector<2x4x2x128xf32>
    %6 = arith.subf %5, %0 : vector<2x4x2x128xf32>
    %7 = math.log %6 : vector<2x4x2x128xf32>
    %cst_8 = arith.constant -1.000000e+02 : f32
    %8 = vector.broadcast %cst_8 : f32 to vector<2x4x2x128xf32>
    %9 = arith.maximumf %7, %8 : vector<2x4x2x128xf32>
    %10 = arith.mulf %1, %4 : vector<2x4x2x128xf32>
    %cst_9 = arith.constant 1.000000e+00 : f32
    %11 = vector.broadcast %cst_9 : f32 to vector<2x4x2x128xf32>
    %12 = arith.subf %11, %1 : vector<2x4x2x128xf32>
    %13 = arith.mulf %12, %9 : vector<2x4x2x128xf32>
    %14 = arith.addf %10, %13 : vector<2x4x2x128xf32>
    %cst_10 = arith.constant 0.000000e+00 : f32
    %15 = vector.broadcast %cst_10 : f32 to vector<2x4x2x128xf32>
    %16 = arith.subf %15, %14 : vector<2x4x2x128xf32>
    %17 = arith.mulf %0, %1 : vector<2x4x2x128xf32>
    %18 = arith.addf %0, %1 : vector<2x4x2x128xf32>
    %c0_i32 = arith.constant 0 : i32
    %19 = arith.cmpi eq, %arg1, %c0_i32 : i32
    %20 = arith.extui %19 : i1 to i32
    %c0_i32_11 = arith.constant 0 : i32
    %21 = arith.cmpi ne, %20, %c0_i32_11 : i32
    scf.if %21 {
      %c0_16 = arith.constant 0 : index
      %c0_17 = arith.constant 0 : index
      %c0_18 = arith.constant 0 : index
      %c0_19 = arith.constant 0 : index
      %28 = vector.load %arg7[%c0_16, %c0_17, %c0_18, %c0_19] : memref<2x4x2x128xf32, #tpu.memory_space<vmem>>, vector<2x4x2x128xf32>
      tpu.vector_store %arg7[%c0_16, %c0_17, %c0_18, %c0_19], %17 {strides = array<i32>} : memref<2x4x2x128xf32, #tpu.memory_space<vmem>>, vector<2x4x2x128xf32>,
      %c0_20 = arith.constant 0 : index
      %c0_21 = arith.constant 0 : index
      %c0_22 = arith.constant 0 : index
      %c0_23 = arith.constant 0 : index
      %29 = vector.load %arg8[%c0_20, %c0_21, %c0_22, %c0_23] : memref<2x4x2x128xf32, #tpu.memory_space<vmem>>, vector<2x4x2x128xf32>
      tpu.vector_store %arg8[%c0_20, %c0_21, %c0_22, %c0_23], %18 {strides = array<i32>} : memref<2x4x2x128xf32, #tpu.memory_space<vmem>>, vector<2x4x2x128xf32>,
      %c0_24 = arith.constant 0 : index
      %c0_25 = arith.constant 0 : index
      %c0_26 = arith.constant 0 : index
      %c0_27 = arith.constant 0 : index
      %30 = vector.load %arg9[%c0_24, %c0_25, %c0_26, %c0_27] : memref<2x4x2x128xf32, #tpu.memory_space<vmem>>, vector<2x4x2x128xf32>
      tpu.vector_store %arg9[%c0_24, %c0_25, %c0_26, %c0_27], %16 {strides = array<i32>} : memref<2x4x2x128xf32, #tpu.memory_space<vmem>>, vector<2x4x2x128xf32>,
    } else {
    }
    %c0_i32_12 = arith.constant 0 : i32
    %22 = arith.cmpi ne, %arg1, %c0_i32_12 : i32
    %23 = arith.extui %22 : i1 to i32
    %c0_i32_13 = arith.constant 0 : i32
    %24 = arith.cmpi ne, %23, %c0_i32_13 : i32
    scf.if %24 {
      %c0_16 = arith.constant 0 : index
      %c0_17 = arith.constant 0 : index
      %c0_18 = arith.constant 0 : index
      %c0_19 = arith.constant 0 : index
      %28 = vector.load %arg7[%c0_16, %c0_17, %c0_18, %c0_19] : memref<2x4x2x128xf32, #tpu.memory_space<vmem>>, vector<2x4x2x128xf32>
      %29 = arith.addf %28, %17 : vector<2x4x2x128xf32>
      %c0_20 = arith.constant 0 : index
      %c0_21 = arith.constant 0 : index
      %c0_22 = arith.constant 0 : index
      %c0_23 = arith.constant 0 : index
      %30 = vector.load %arg7[%c0_20, %c0_21, %c0_22, %c0_23] : memref<2x4x2x128xf32, #tpu.memory_space<vmem>>, vector<2x4x2x128xf32>
      tpu.vector_store %arg7[%c0_20, %c0_21, %c0_22, %c0_23], %29 {strides = array<i32>} : memref<2x4x2x128xf32, #tpu.memory_space<vmem>>, vector<2x4x2x128xf32>,
      %c0_24 = arith.constant 0 : index
      %c0_25 = arith.constant 0 : index
      %c0_26 = arith.constant 0 : index
      %c0_27 = arith.constant 0 : index
      %31 = vector.load %arg8[%c0_24, %c0_25, %c0_26, %c0_27] : memref<2x4x2x128xf32, #tpu.memory_space<vmem>>, vector<2x4x2x128xf32>
      %32 = arith.addf %31, %18 : vector<2x4x2x128xf32>
      %c0_28 = arith.constant 0 : index
      %c0_29 = arith.constant 0 : index
      %c0_30 = arith.constant 0 : index
      %c0_31 = arith.constant 0 : index
      %33 = vector.load %arg8[%c0_28, %c0_29, %c0_30, %c0_31] : memref<2x4x2x128xf32, #tpu.memory_space<vmem>>, vector<2x4x2x128xf32>
      tpu.vector_store %arg8[%c0_28, %c0_29, %c0_30, %c0_31], %32 {strides = array<i32>} : memref<2x4x2x128xf32, #tpu.memory_space<vmem>>, vector<2x4x2x128xf32>,
      %c0_32 = arith.constant 0 : index
      %c0_33 = arith.constant 0 : index
      %c0_34 = arith.constant 0 : index
      %c0_35 = arith.constant 0 : index
      %34 = vector.load %arg9[%c0_32, %c0_33, %c0_34, %c0_35] : memref<2x4x2x128xf32, #tpu.memory_space<vmem>>, vector<2x4x2x128xf32>
      %35 = arith.addf %34, %16 : vector<2x4x2x128xf32>
      %c0_36 = arith.constant 0 : index
      %c0_37 = arith.constant 0 : index
      %c0_38 = arith.constant 0 : index
      %c0_39 = arith.constant 0 : index
      %36 = vector.load %arg9[%c0_36, %c0_37, %c0_38, %c0_39] : memref<2x4x2x128xf32, #tpu.memory_space<vmem>>, vector<2x4x2x128xf32>
      tpu.vector_store %arg9[%c0_36, %c0_37, %c0_38, %c0_39], %35 {strides = array<i32>} : memref<2x4x2x128xf32, #tpu.memory_space<vmem>>, vector<2x4x2x128xf32>,
    } else {
    }
    %c0_i32_14 = arith.constant 0 : i32
    %25 = arith.cmpi eq, %arg1, %c0_i32_14 : i32
    %26 = arith.extui %25 : i1 to i32
    %c0_i32_15 = arith.constant 0 : i32
    %27 = arith.cmpi ne, %26, %c0_i32_15 : i32
    scf.if %27 {
      %c0_16 = arith.constant 0 : index
      %c0_17 = arith.constant 0 : index
      %c0_18 = arith.constant 0 : index
      %c0_19 = arith.constant 0 : index
      %28 = vector.load %arg7[%c0_16, %c0_17, %c0_18, %c0_19] : memref<2x4x2x128xf32, #tpu.memory_space<vmem>>, vector<2x4x2x128xf32>
      %cst_20 = arith.constant dense<0.000000e+00> : vector<2x4x2xf32>
      %29 = vector.multi_reduction <add>, %28, %cst_20 [3] : vector<2x4x2x128xf32> to vector<2x4x2xf32>
      %cst_21 = arith.constant dense<0.000000e+00> : vector<2x4xf32>
      %30 = vector.multi_reduction <add>, %29, %cst_21 [2] : vector<2x4x2xf32> to vector<2x4xf32>
      %c0_22 = arith.constant 0 : index
      %c0_23 = arith.constant 0 : index
      %c0_24 = arith.constant 0 : index
      %31 = vector.load %arg4[%c0_22, %c0_23, %c0_24] : memref<1x2x4xf32, #tpu.memory_space<vmem>>, vector<1x2x4xf32>
      %32 = vector.shape_cast %31 : vector<1x2x4xf32> to vector<2x4xf32>
      %33 = vector.shape_cast %30 : vector<2x4xf32> to vector<1x2x4xf32>
      tpu.vector_store %arg4[%c0_22, %c0_23, %c0_24], %33 {strides = array<i32>} : memref<1x2x4xf32, #tpu.memory_space<vmem>>, vector<1x2x4xf32>,
      %c0_25 = arith.constant 0 : index
      %c0_26 = arith.constant 0 : index
      %c0_27 = arith.constant 0 : index
      %c0_28 = arith.constant 0 : index
      %34 = vector.load %arg8[%c0_25, %c0_26, %c0_27, %c0_28] : memref<2x4x2x128xf32, #tpu.memory_space<vmem>>, vector<2x4x2x128xf32>
      %cst_29 = arith.constant dense<0.000000e+00> : vector<2x4x2xf32>
      %35 = vector.multi_reduction <add>, %34, %cst_29 [3] : vector<2x4x2x128xf32> to vector<2x4x2xf32>
      %cst_30 = arith.constant dense<0.000000e+00> : vector<2x4xf32>
      %36 = vector.multi_reduction <add>, %35, %cst_30 [2] : vector<2x4x2xf32> to vector<2x4xf32>
      %c0_31 = arith.constant 0 : index
      %c0_32 = arith.constant 0 : index
      %c0_33 = arith.constant 0 : index
      %37 = vector.load %arg5[%c0_31, %c0_32, %c0_33] : memref<1x2x4xf32, #tpu.memory_space<vmem>>, vector<1x2x4xf32>
      %38 = vector.shape_cast %37 : vector<1x2x4xf32> to vector<2x4xf32>
      %39 = vector.shape_cast %36 : vector<2x4xf32> to vector<1x2x4xf32>
      tpu.vector_store %arg5[%c0_31, %c0_32, %c0_33], %39 {strides = array<i32>} : memref<1x2x4xf32, #tpu.memory_space<vmem>>, vector<1x2x4xf32>,
      %c0_34 = arith.constant 0 : index
      %c0_35 = arith.constant 0 : index
      %c0_36 = arith.constant 0 : index
      %c0_37 = arith.constant 0 : index
      %40 = vector.load %arg9[%c0_34, %c0_35, %c0_36, %c0_37] : memref<2x4x2x128xf32, #tpu.memory_space<vmem>>, vector<2x4x2x128xf32>
      %cst_38 = arith.constant dense<0.000000e+00> : vector<2x4x2xf32>
      %41 = vector.multi_reduction <add>, %40, %cst_38 [3] : vector<2x4x2x128xf32> to vector<2x4x2xf32>
      %cst_39 = arith.constant dense<0.000000e+00> : vector<2x4xf32>
      %42 = vector.multi_reduction <add>, %41, %cst_39 [2] : vector<2x4x2xf32> to vector<2x4xf32>
      %c0_40 = arith.constant 0 : index
      %c0_41 = arith.constant 0 : index
      %c0_42 = arith.constant 0 : index
      %43 = vector.load %arg6[%c0_40, %c0_41, %c0_42] : memref<1x2x4xf32, #tpu.memory_space<vmem>>, vector<1x2x4xf32>
      %44 = vector.shape_cast %43 : vector<1x2x4xf32> to vector<2x4xf32>
      %45 = vector.shape_cast %42 : vector<2x4xf32> to vector<1x2x4xf32>
      tpu.vector_store %arg6[%c0_40, %c0_41, %c0_42], %45 {strides = array<i32>} : memref<1x2x4xf32, #tpu.memory_space<vmem>>, vector<1x2x4xf32>,
    } else {
    }
    return
  }
  func.func @transform_0(%arg0: i32, %arg1: i32) -> (i32, i32, i32, i32) {
    %c1_i32 = arith.constant 1 : i32
    %0 = arith.muli %arg0, %c1_i32 : i32
    %1 = arith.addi %0, %arg1 : i32
    %c0_i32 = arith.constant 0 : i32
    %c0_i32_0 = arith.constant 0 : i32
    %c0_i32_1 = arith.constant 0 : i32
    %c0_i32_2 = arith.constant 0 : i32
    return %c0_i32, %c0_i32_0, %1, %c0_i32_1 : i32, i32, i32, i32
  }
  func.func @transform_1(%arg0: i32, %arg1: i32) -> (i32, i32, i32, i32) {
    %c1_i32 = arith.constant 1 : i32
    %0 = arith.muli %arg0, %c1_i32 : i32
    %1 = arith.addi %0, %arg1 : i32
    %c0_i32 = arith.constant 0 : i32
    %c0_i32_0 = arith.constant 0 : i32
    %c0_i32_1 = arith.constant 0 : i32
    %c0_i32_2 = arith.constant 0 : i32
    return %c0_i32, %c0_i32_0, %1, %c0_i32_1 : i32, i32, i32, i32
  }
  func.func @transform_2(%arg0: i32, %arg1: i32) -> (i32, i32, i32) {
    %c0_i32 = arith.constant 0 : i32
    %c0_i32_0 = arith.constant 0 : i32
    %c0_i32_1 = arith.constant 0 : i32
    return %arg0, %c0_i32, %c0_i32_0 : i32, i32, i32
  }
  func.func @transform_3(%arg0: i32, %arg1: i32) -> (i32, i32, i32) {
    %c0_i32 = arith.constant 0 : i32
    %c0_i32_0 = arith.constant 0 : i32
    %c0_i32_1 = arith.constant 0 : i32
    return %arg0, %c0_i32, %c0_i32_0 : i32, i32, i32
  }
  func.func @transform_4(%arg0: i32, %arg1: i32) -> (i32, i32, i32) {
    %c0_i32 = arith.constant 0 : i32
    %c0_i32_0 = arith.constant 0 : i32
    %c0_i32_1 = arith.constant 0 : i32
    return %arg0, %c0_i32, %c0_i32_0 : i32, i32, i32
  }
}

</mosaic_0001>

<bundles_post_ra>
// kernel: tpu_custom_call.1
= control target key start
LH: loop header
LB: loop body
LE: loop exit
PB: predicated region body
PF: predicated region fallthrough
CT: control target
= control target key end

     0   :  { %10 = vsyncpa [#allocation6], 0  ;;  %s1058_s0 = inlined_call_operand.hbm [shape: f32[2,4,2,128], index: 0, kind: input, shape index: {}]   ;;  %s1059_s1 = inlined_call_operand.hbm [shape: f32[2,4,2,128], index: 1, kind: input, shape index: {}]   ;;  %s1060_s2 = inlined_call_operand.hbm [shape: f32[1,2,4], index: 2, kind: output, shape index: {0}]   ;;  %s1061_s3 = inlined_call_operand.hbm [shape: f32[1,2,4], index: 3, kind: output, shape index: {1}]   ;;  %s1062_s4 = inlined_call_operand.hbm [shape: f32[1,2,4], index: 4, kind: output, shape index: {2}]  }
   0x1   :  { %11 = vsyncpa [#allocation9], 0 }
   0x2   :  { %12 = vsyncpa [#allocation7], 0 }
   0x3   :  { %13 = vsyncpa [#allocation12], 0  ;;  %s792_s15 = smov [#allocation5]   ;;  %s674_s19 = scalar_lea.hbm %s1058_s0, 256 }
   0x4   :  { %s22_s16 = sshll.u32 %s792_s15, 4  ;;  %p675_p0 = scmp.ne.s32.totalorder %s1058_s0, %s674_s19  ;;  %s23_s16 = int_to_ptr.vmem [resolvable:$true] %s22_s16 }
   0x5   :  { %p678_p1 = scmp.lt.u32.totalorder %s674_s19, %s1058_s0 }
   0x7   :  { %p680_p2 = pnand %p678_p1, %p675_p0 }
   0x9   :  { %683 = shalt.err (!%p680_p2)
}
   0xa   :  { %s684_s24 = scalar_lea.vmem %s23_s16, 256  ;;  %p689_p4 = scmp.lt.s32.totalorder %s23_s16, %s23_s16 }
   0xb   :  { %p685_p3 = scmp.ne.s32.totalorder %s23_s16, %s684_s24  ;;  %p690_p5 = scmp.lt.s32.totalorder %s684_s24, %s684_s24 }
   0xd   :  { %p691_p6 = por %p690_p5, %p689_p4 }
   0xf   :  { %p692_p7 = pnand %p691_p6, %p685_p3 }
  0x11   :  { %695 = shalt.err (!%p692_p7)
}
  0x12   :  { %s793_s25 = smov 32   ;;  %s794_s26 = smov 2  }
  0x13   :  { %28 = dma.hbm_to_vmem [thread:$0]  %s1058_s0, 256, %s23_s16, [#allocation6], %s793_s25, %s793_s25, %s794_s26  }
  0x14   :  { %s795_s29 = smov [#allocation8]   ;;  %s696_s7 = scalar_lea.hbm %s1059_s1, 256 }
  0x15   :  { %s37_s30 = sshll.u32 %s795_s29, 4  ;;  %p697_p8 = scmp.ne.s32.totalorder %s1059_s1, %s696_s7  ;;  %s38_s30 = int_to_ptr.vmem [resolvable:$true] %s37_s30 }
  0x16   :  { %p700_p9 = scmp.lt.u32.totalorder %s696_s7, %s1059_s1 }
  0x18   :  { %p702_p10 = pnand %p700_p9, %p697_p8 }
  0x1a   :  { %705 = shalt.err (!%p702_p10)
}
  0x1b   :  { %s706_s12 = scalar_lea.vmem %s38_s30, 256  ;;  %p711_p12 = scmp.lt.s32.totalorder %s38_s30, %s38_s30 }
  0x1c   :  { %p707_p11 = scmp.ne.s32.totalorder %s38_s30, %s706_s12  ;;  %p712_p13 = scmp.lt.s32.totalorder %s706_s12, %s706_s12 }
  0x1e   :  { %p713_p0 = por %p712_p13, %p711_p12 }
  0x20   :  { %p714_p1 = pnand %p713_p0, %p707_p11 }
  0x22   :  { %717 = shalt.err (!%p714_p1)
}
  0x23   :  { %43 = dma.hbm_to_vmem [thread:$0]  %s1059_s1, 256, %s38_s30, [#allocation9], %s793_s25, %s793_s25, %s794_s26  }
  0x24   :  { %784 = dma.done.wait [#allocation6], 256  }
  0x25   :  { %785 = vsyncadd [#allocation6], 4294967040 }
  0x26   :  { %786 = dma.done.wait [#allocation9], 256  }
  0x27   :  { %787 = vsyncadd [#allocation9], 4294967040  ;;  %v848_v0 = vld [vmem:[#allocation5 + $0x8] sm:$0x3]  ;;  %v850_v1 = vld [vmem:[#allocation8 + $0x8] sm:$0x3] }
  0x28   :  { %v52_v2 = vld [vmem:[#allocation5] sm:$0x3]  ;;  %v176_v3 = vadd.f32 %v850_v1, %v848_v0  ;;  %v854_v4 = vld [vmem:[#allocation8] sm:$0x3]  ;;  %v57_v5 = vld [vmem:[#allocation5 + $0xa] sm:$0x3]  ;;  %642 = vlog2.f32 %v848_v0  ;;  %v168_v15 = vmul.f32 %v850_v1, %v848_v0 }
  0x29   :  { %v172_v6 = vadd.f32 %v854_v4, %v52_v2  ;;  %v92_v7 = vsub.f32 1.0, %v52_v2  ;;  %v858_v8 = vld [vmem:[#allocation8 + $0xa] sm:$0x3]  ;;  %v53_v9 = vld [vmem:[#allocation5 + $0x2] sm:$0x3]  ;;  %v164_v10 = vmul.f32 %v854_v4, %v52_v2  ;;  %644 = vlog2.f32 %v52_v2  ;;  %s796_s1 = smov [#allocation11]  }
  0x2a   :  { %196 = vst [vmem:[#allocation3 + $0x8] sm:$0x3] %v176_v3  ;;  %v177_v11 = vadd.f32 %v858_v8, %v57_v5  ;;  %v862_v12 = vld [vmem:[#allocation8 + $0x2] sm:$0x3]  ;;  %v93_v13 = vsub.f32 1.0, %v53_v9  ;;  %v169_v14 = vmul.f32 %v858_v8, %v57_v5  ;;  %v97_v21 = vsub.f32 1.0, %v57_v5 }
  0x2b   :  { %v58_v16 = vld [vmem:[#allocation5 + $0xc] sm:$0x3]  ;;  %192 = vst [vmem:[#allocation3] sm:$0x3] %v172_v6  ;;  %v173_v17 = vadd.f32 %v862_v12, %v53_v9  ;;  %v165_v18 = vmul.f32 %v862_v12, %v53_v9  ;;  %184 = vst [vmem:[#allocation2] sm:$0x3] %v164_v10  ;;  %646 = vlog2.f32 %v53_v9 }
  0x2c   :  { %v869_v19 = vld [vmem:[#allocation8 + $0xc] sm:$0x3]  ;;  %v54_v20 = vld [vmem:[#allocation5 + $0x4] sm:$0x3]  ;;  %197 = vst [vmem:[#allocation3 + $0xa] sm:$0x3] %v177_v11  ;;  %648 = vlog2.f32 %v93_v13 }
  0x2d   :  { %189 = vst [vmem:[#allocation2 + $0xa] sm:$0x3] %v169_v14  ;;  %188 = vst [vmem:[#allocation2 + $0x8] sm:$0x3] %v168_v15  ;;  %v178_v22 = vadd.f32 %v869_v19, %v58_v16  ;;  %v872_v23 = vld [vmem:[#allocation8 + $0x4] sm:$0x3]  ;;  %v170_v24 = vmul.f32 %v869_v19, %v58_v16  ;;  %650 = vlog2.f32 %v92_v7 }
  0x2e   :  { %v875_v25 = vld [vmem:[#allocation5 + $0xe] sm:$0x3]  ;;  %v96_v26 = vsub.f32 1.0, %v848_v0  ;;  %193 = vst [vmem:[#allocation3 + $0x2] sm:$0x3] %v173_v17  ;;  %v174_v27 = vadd.f32 %v872_v23, %v54_v20  ;;  %v166_v28 = vmul.f32 %v872_v23, %v54_v20  ;;  %vm295_vm0 = vcmask 1041408  }
  0x2f   :  { %185 = vst [vmem:[#allocation2 + $0x2] sm:$0x3] %v165_v18  ;;  %v880_v29 = vld [vmem:[#allocation8 + $0xe] sm:$0x3]  ;;  %v882_v30 = vld [vmem:[#allocation5 + $0x6] sm:$0x3]  ;;  %652 = vlog2.f32 %v57_v5 }
  0x30   :  { %198 = vst [vmem:[#allocation3 + $0xc] sm:$0x3] %v178_v22  ;;  %190 = vst [vmem:[#allocation2 + $0xc] sm:$0x3] %v170_v24  ;;  %v179_v31 = vadd.f32 %v880_v29, %v875_v25  ;;  %v886_v32 = vld [vmem:[#allocation8 + $0x6] sm:$0x3]  ;;  %v171_v33 = vmul.f32 %v880_v29, %v875_v25  ;;  %654 = vlog2.f32 %v97_v21 }
  0x31   :  { %v98_v34 = vsub.f32 1.0, %v58_v16  ;;  %194 = vst [vmem:[#allocation3 + $0x4] sm:$0x3] %v174_v27  ;;  %186 = vst [vmem:[#allocation2 + $0x4] sm:$0x3] %v166_v28  ;;  %v175_v35 = vadd.f32 %v886_v32, %v882_v30  ;;  %v167_v36 = vmul.f32 %v886_v32, %v882_v30  ;;  %v94_v38 = vsub.f32 1.0, %v54_v20 }
  0x32   :  { %199 = vst [vmem:[#allocation3 + $0xe] sm:$0x3] %v179_v31  ;;  %191 = vst [vmem:[#allocation2 + $0xe] sm:$0x3] %v171_v33  ;;  %v398_v37 = vld [vmem:[#allocation3 + $0x8] sm:$0x3]  ;;  %656 = vlog2.f32 %v96_v26  ;;  %v643_v43 = vpop.eup %642 }
  0x33   :  { %195 = vst [vmem:[#allocation3 + $0x6] sm:$0x3] %v175_v35  ;;  %187 = vst [vmem:[#allocation2 + $0x6] sm:$0x3] %v167_v36  ;;  %v414_v39 = vsel %vm295_vm0, %v398_v37, 0.0  ;;  %v99_v41 = vsub.f32 1.0, %v875_v25  ;;  %658 = vlog2.f32 %v58_v16  ;;  %v645_v52 = vpop.eup %644 }
  0x34   :  { %v394_v40 = vld [vmem:[#allocation3] sm:$0x3]  ;;  %v133_v42 = vsub.f32 1.0, %v862_v12  ;;  %415 = vadd.xlane.f32.xlu1 %v414_v39  ;;  %v399_v45 = vld [vmem:[#allocation3 + $0xa] sm:$0x3]  ;;  %v95_v46 = vsub.f32 1.0, %v882_v30  ;;  %660 = vlog2.f32 %v98_v34 }
  0x35   :  { %v402_v44 = vsel %vm295_vm0, %v394_v40, 0.0  ;;  %v132_v47 = vsub.f32 1.0, %v854_v4  ;;  %v417_v48 = vsel %vm295_vm0, %v399_v45, 0.0  ;;  %v395_v49 = vld [vmem:[#allocation3 + $0x2] sm:$0x3]  ;;  %v137_v51 = vsub.f32 1.0, %v858_v8  ;;  %v647_v57 = vpop.eup %646 }
  0x36   :  { %403 = vadd.xlane.f32.xlu0 %v402_v44  ;;  %v287_v50 = vld [vmem:[#allocation2] sm:$0x3]  ;;  %662 = vlog2.f32 %v54_v20  ;;  %v405_v53 = vsel %vm295_vm0, %v395_v49, 0.0  ;;  %v288_v54 = vld [vmem:[#allocation2 + $0x2] sm:$0x3]  ;;  %v136_v56 = vsub.f32 1.0, %v850_v1  ;;  %v649_v62 = vpop.eup %648 }
  0x37   :  { %v292_v55 = vld [vmem:[#allocation2 + $0xa] sm:$0x3]  ;;  %664 = vlog2.f32 %v94_v38  ;;  %v291_v58 = vld [vmem:[#allocation2 + $0x8] sm:$0x3]  ;;  %v400_v59 = vld [vmem:[#allocation3 + $0xc] sm:$0x3]  ;;  %v651_v5 = vpop.eup %650 }
  0x38   :  { %v138_v60 = vsub.f32 1.0, %v869_v19  ;;  %v134_v61 = vsub.f32 1.0, %v872_v23  ;;  %666 = vlog2.f32 %v875_v25  ;;  %418 = vadd.xlane.f32.xlu1 %v417_v48  ;;  %v396_v63 = vld [vmem:[#allocation3 + $0x4] sm:$0x3]  ;;  %v293_v0 = vld [vmem:[#allocation2 + $0xc] sm:$0x3] }
  0x39   :  { %668 = vlog2.f32 %v99_v41  ;;  %v139_v2 = vsub.f32 1.0, %v880_v29  ;;  %v135_v3 = vsub.f32 1.0, %v886_v32  ;;  %v299_v6 = vsel %vm295_vm0, %v288_v54, 0.0  ;;  %v289_v10 = vld [vmem:[#allocation2 + $0x4] sm:$0x3]  ;;  %v653_v11 = vpop.eup %652  ;;  %s608_s14 = sshll.u32 %s796_s1, 4  ;;  %s609_s14 = int_to_ptr.vmem [resolvable:$true] %s608_s14 }
  0x3a   :  { %406 = vadd.xlane.f32.xlu0 %v405_v53  ;;  %v296_v7 = vsel %vm295_vm0, %v287_v50, 0.0  ;;  %v311_v9 = vsel %vm295_vm0, %v292_v55, 0.0  ;;  %670 = vlog2.f32 %v882_v30  ;;  %v308_v13 = vsel %vm295_vm0, %v291_v58, 0.0  ;;  %v655_v16 = vpop.eup %654  ;;  %s797_s15 = smov [#allocation10]   ;;  %s718_s17 = scalar_lea.vmem %s609_s14, 32 }
  0x3b   :  { %v420_v14 = vsel %vm295_vm0, %v400_v59, 0.0  ;;  %v71_v15 = vmul.f32 0.6931472, %v647_v57  ;;  %672 = vlog2.f32 %v95_v46  ;;  %v408_v17 = vsel %vm295_vm0, %v396_v63, 0.0  ;;  %s598_s16 = sshll.u32 %s797_s15, 4  ;;  %p719_p2 = scmp.ne.s32.totalorder %s609_s14, %s718_s17  ;;  %s599_s16 = int_to_ptr.vmem [resolvable:$true] %s598_s16 }
  0x3c   :  { %v917_v18 = vsel %vm295_vm0, %v293_v0, 0.0  ;;  %v103_v20 = vmul.f32 0.6931472, %v649_v62  ;;  %v69_v21 = vmul.f32 0.6931472, %v645_v52  ;;  %v657_v22 = vpop.eup %656  ;;  %300 = vadd.xlane.f32.xlu1 %v299_v6  ;;  %v920_v24 = vsel %vm295_vm0, %v289_v10, 0.0  ;;  %p723_p3 = scmp.lt.s32.totalorder %s609_s14, %s609_s14  ;;  %p724_p4 = scmp.lt.s32.totalorder %s718_s17, %s718_s17 }
  0x3d   :  { %v85_v25 = vmax.f32 %v71_v15, -100.0  ;;  %v101_v26 = vmul.f32 0.6931472, %v651_v5  ;;  %v79_v27 = vmul.f32 0.6931472, %v653_v11  ;;  %v659_v28 = vpop.eup %658  ;;  %vm362_vm1 = vcmask 1041409  }
  0x3e   :  { %297 = vadd.xlane.f32.xlu0 %v296_v7  ;;  %v117_v30 = vmax.f32 %v103_v20, -100.0  ;;  %v84_v31 = vmax.f32 %v69_v21, -100.0  ;;  %v111_v33 = vmul.f32 0.6931472, %v655_v16  ;;  %v77_v34 = vmul.f32 0.6931472, %v643_v43  ;;  %v661_v35 = vpop.eup %660  ;;  %p725_p5 = por %p724_p4, %p723_p3 }
  0x3f   :  { %v125_v36 = vmul.f32 %v85_v25, %v862_v12  ;;  %v116_v37 = vmax.f32 %v101_v26, -100.0  ;;  %v89_v38 = vmax.f32 %v79_v27, -100.0  ;;  %v109_v39 = vmul.f32 0.6931472, %v657_v22  ;;  %v401_v11 = vld [vmem:[#allocation3 + $0xe] sm:$0x3] }
  0x40   :  { %v663_v40 = vpop.eup %662  ;;  %v141_v41 = vmul.f32 %v133_v42, %v117_v30  ;;  %v124_v44 = vmul.f32 %v84_v31, %v854_v4  ;;  %v121_v45 = vmax.f32 %v111_v33, -100.0  ;;  %v88_v46 = vmax.f32 %v77_v34, -100.0  ;;  %312 = vadd.xlane.f32.xlu1 %v311_v9  ;;  %v397_v22 = vld [vmem:[#allocation3 + $0x6] sm:$0x3]  ;;  %p726_p6 = pnand %p725_p5, %p719_p2 }
  0x41   :  { %v665_v48 = vpop.eup %664  ;;  %v140_v49 = vmul.f32 %v132_v47, %v116_v37  ;;  %v129_v43 = vmul.f32 %v89_v38, %v858_v8  ;;  %v120_v50 = vmax.f32 %v109_v39, -100.0  ;;  %v81_v52 = vmul.f32 0.6931472, %v659_v28 }
  0x42   :  { %v667_v53 = vpop.eup %666  ;;  %309 = vadd.xlane.f32.xlu0 %v308_v13  ;;  %v149_v54 = vadd.f32 %v141_v41, %v125_v36  ;;  %v145_v12 = vmul.f32 %v137_v51, %v121_v45  ;;  %v128_v42 = vmul.f32 %v88_v46, %v850_v1  ;;  %v113_v55 = vmul.f32 0.6931472, %v661_v35  ;;  %v290_v36 = vld [vmem:[#allocation2 + $0x6] sm:$0x3] }
  0x43   :  { %v669_v57 = vpop.eup %668  ;;  %v148_v58 = vadd.f32 %v140_v49, %v124_v44  ;;  %v144_v59 = vmul.f32 %v136_v56, %v120_v50  ;;  %v90_v4 = vmax.f32 %v81_v52, -100.0  ;;  %v73_v47 = vmul.f32 0.6931472, %v663_v40 }
  0x44   :  { %v671_v62 = vpop.eup %670  ;;  %v157_v63 = vsub.f32 0.0, %v149_v54  ;;  %v153_v0 = vadd.f32 %v145_v12, %v129_v43  ;;  %v122_v5 = vmax.f32 %v113_v55, -100.0  ;;  %v105_v6 = vmul.f32 0.6931472, %v665_v48  ;;  %421 = vadd.xlane.f32.xlu1 %v420_v14 }
  0x45   :  { %v673_v7 = vpop.eup %672  ;;  %v156_v9 = vsub.f32 0.0, %v148_v58  ;;  %v152_v8 = vadd.f32 %v144_v59, %v128_v42  ;;  %v130_v51 = vmul.f32 %v90_v4, %v869_v19  ;;  %v86_v10 = vmax.f32 %v73_v47, -100.0 }
  0x46   :  { %409 = vadd.xlane.f32.xlu0 %v408_v17  ;;  %201 = vst [vmem:[#allocation4 + $0x2] sm:$0x3] %v157_v63  ;;  %v161_v13 = vsub.f32 0.0, %v153_v0  ;;  %v146_v1 = vmul.f32 %v138_v60, %v122_v5  ;;  %v118_v56 = vmax.f32 %v105_v6, -100.0  ;;  %v83_v15 = vmul.f32 0.6931472, %v667_v53 }
  0x47   :  { %200 = vst [vmem:[#allocation4] sm:$0x3] %v156_v9  ;;  %v160_v16 = vsub.f32 0.0, %v152_v8  ;;  %v126_v20 = vmul.f32 %v86_v10, %v872_v23  ;;  %v115_v21 = vmul.f32 0.6931472, %v669_v57  ;;  %v423_v19 = vsel %vm295_vm0, %v401_v11, 0.0 }
  0x48   :  { %v75_v14 = vmul.f32 0.6931472, %v671_v62  ;;  %205 = vst [vmem:[#allocation4 + $0xa] sm:$0x3] %v161_v13  ;;  %v154_v25 = vadd.f32 %v146_v1, %v130_v51  ;;  %v142_v17 = vmul.f32 %v134_v61, %v118_v56  ;;  %v91_v26 = vmax.f32 %v83_v15, -100.0  ;;  %315 = vadd.xlane.f32.xlu1 %v917_v18 }
  0x49   :  { %v107_v27 = vmul.f32 0.6931472, %v673_v7  ;;  %204 = vst [vmem:[#allocation4 + $0x8] sm:$0x3] %v160_v16  ;;  %v123_v60 = vmax.f32 %v115_v21, -100.0  ;;  %v411_v35 = vsel %vm295_vm0, %v397_v22, 0.0  ;;  %v328_v0 = vlaneseq }
  0x4a   :  { %v87_v28 = vmax.f32 %v75_v14, -100.0  ;;  %303 = vadd.xlane.f32.xlu0 %v920_v24  ;;  %v162_v30 = vsub.f32 0.0, %v154_v25  ;;  %v150_v31 = vadd.f32 %v142_v17, %v126_v20  ;;  %v131_v33 = vmul.f32 %v91_v26, %v880_v29  ;;  %v294_v23 = vld [vmem:[#allocation2 + $0xe] sm:$0x3] }
  0x4b   :  { %v119_v34 = vmax.f32 %v107_v27, -100.0  ;;  %v147_v61 = vmul.f32 %v139_v2, %v123_v60  ;;  %v317_v39 = vsel %vm295_vm0, %v294_v23, 0.0  ;;  %v305_v41 = vsel %vm295_vm0, %v290_v36, 0.0 }
  0x4c   :  { %v127_v18 = vmul.f32 %v87_v28, %v886_v32  ;;  %206 = vst [vmem:[#allocation4 + $0xc] sm:$0x3] %v162_v30  ;;  %v158_v37 = vsub.f32 0.0, %v150_v31  ;;  %424 = vadd.xlane.f32.xlu1 %v423_v19  ;;  %v329_v7 = vand.u32 127, %v328_v0  ;;  %v331_v9 = vshrl.u32 %v328_v0, 7 }
  0x4d   :  { %v143_v38 = vmul.f32 %v135_v3, %v119_v34  ;;  %v155_v24 = vadd.f32 %v147_v61, %v131_v33  ;;  %v494_v44 = vld [vmem:[#allocation4 + $0x2] sm:$0x3]  ;;  %vm364_vm2 = vcmask 1042434   ;;  %vm366_vm3 = vcmask 1043459  }
  0x4e   :  { %412 = vadd.xlane.f32.xlu0 %v411_v35  ;;  %202 = vst [vmem:[#allocation4 + $0x4] sm:$0x3] %v158_v37  ;;  %v493_v2 = vld [vmem:[#allocation4] sm:$0x3]  ;;  %v504_v46 = vsel %vm295_vm0, %v494_v44, 0.0  ;;  %v960_v10 = vsub.s32 %v329_v7, %v331_v9  ;;  %vm373_vm4 = vcmask 11264  }
  0x4f   :  { %v151_v40 = vadd.f32 %v143_v38, %v127_v18  ;;  %v163_v29 = vsub.f32 0.0, %v155_v24  ;;  %v501_v32 = vsel %vm295_vm0, %v493_v2, 0.0  ;;  %v498_v3 = vld [vmem:[#allocation4 + $0xa] sm:$0x3]  ;;  %vm392_vm5 = vcmask 25600  }
  0x50   :  { %318 = vadd.xlane.f32.xlu1 %v317_v39  ;;  %v497_v48 = vld [vmem:[#allocation4 + $0x8] sm:$0x3]  ;;  %v516_v49 = vsel %vm295_vm0, %v498_v3, 0.0 }
  0x51   :  { %v159_v45 = vsub.f32 0.0, %v151_v40  ;;  %207 = vst [vmem:[#allocation4 + $0xe] sm:$0x3] %v163_v29  ;;  %v513_v43 = vsel %vm295_vm0, %v497_v48, 0.0 }
  0x52   :  { %306 = vadd.xlane.f32.xlu0 %v305_v41 }
  0x53   :  { %203 = vst [vmem:[#allocation4 + $0x6] sm:$0x3] %v159_v45  ;;  %v499_v50 = vld [vmem:[#allocation4 + $0xc] sm:$0x3] }
  0x54   :  { %505 = vadd.xlane.f32.xlu1 %v504_v46  ;;  %v519_v53 = vsel %vm295_vm0, %v499_v50, 0.0 }
  0x55   :  { %v495_v52 = vld [vmem:[#allocation4 + $0x4] sm:$0x3] }
  0x56   :  { %502 = vadd.xlane.f32.xlu0 %v501_v32  ;;  %v507_v54 = vsel %vm295_vm0, %v495_v52, 0.0 }
  0x58   :  { %517 = vadd.xlane.f32.xlu1 %v516_v49  ;;  %v500_v12 = vld [vmem:[#allocation4 + $0xe] sm:$0x3] }
  0x59   :  { %v522_v55 = vsel %vm295_vm0, %v500_v12, 0.0 }
  0x5a   :  { %514 = vadd.xlane.f32.xlu0 %v513_v43  ;;  %v496_v42 = vld [vmem:[#allocation4 + $0x6] sm:$0x3] }
  0x5b   :  { %v510_v57 = vsel %vm295_vm0, %v496_v42, 0.0 }
  0x5c   :  { %520 = vadd.xlane.f32.xlu1 %v519_v53 }
  0x5e   :  { %508 = vadd.xlane.f32.xlu0 %v507_v54 }
  0x60   :  { %523 = vadd.xlane.f32.xlu1 %v522_v55 }
  0x62   :  { %511 = vadd.xlane.f32.xlu0 %v510_v57 }
  0xc1   :  { %v416_v58 = vpop.xlane.xlu1 %415 }
  0xc2   :  { %v453_v15 = vrot.slane %v416_v58, %v960_v10 }
  0xc3   :  { %v404_v59 = vpop.xlane.xlu0 %403 }
  0xc4   :  { %v437_v16 = vrot.slane %v404_v59, %v960_v10 }
  0xc5   :  { %v419_v4 = vpop.xlane.xlu1 %418 }
  0xc6   :  { %v457_v11 = vrot.slane %v419_v4, %v960_v10 }
  0xc7   :  { %v407_v47 = vpop.xlane.xlu0 %406 }
  0xc8   :  { %v441_v13 = vrot.slane %v407_v47, %v960_v10  ;;  %v469_v14 = vsel %vm362_vm1, %v457_v11, %v453_v15 }
  0xc9   :  { %v301_v62 = vpop.xlane.xlu1 %300 }
  0xca   :  { %v466_v22 = vsel %vm362_vm1, %v441_v13, %v437_v16  ;;  %v337_v17 = vrot.slane %v301_v62, %v960_v10 }
  0xcb   :  { %v298_v63 = vpop.xlane.xlu0 %297 }
  0xcc   :  { %v333_v28 = vrot.slane %v298_v63, %v960_v10 }
  0xcd   :  { %v313_v5 = vpop.xlane.xlu1 %312 }
  0xce   :  { %v353_v26 = vrot.slane %v313_v5, %v960_v10  ;;  %v363_v40 = vsel %vm362_vm1, %v337_v17, %v333_v28 }
  0xcf   :  { %v310_v6 = vpop.xlane.xlu0 %309 }
  0xd0   :  { %v349_v27 = vrot.slane %v310_v6, %v960_v10 }
  0xd1   :  { %v422_v8 = vpop.xlane.xlu1 %421 }
  0xd2   :  { %v461_v20 = vrot.slane %v422_v8, %v960_v10  ;;  %v368_v37 = vsel %vm362_vm1, %v353_v26, %v349_v27 }
  0xd3   :  { %v410_v51 = vpop.xlane.xlu0 %409 }
  0xd4   :  { %v445_v21 = vrot.slane %v410_v51, %v960_v10  ;;  %v470_v33 = vsel %vm364_vm2, %v461_v20, %v469_v14 }
  0xd5   :  { %v316_v1 = vpop.xlane.xlu1 %315 }
  0xd6   :  { %v357_v30 = vrot.slane %v316_v1, %v960_v10  ;;  %v467_v23 = vsel %vm364_vm2, %v445_v21, %v466_v22 }
  0xd7   :  { %v304_v56 = vpop.xlane.xlu0 %303 }
  0xd8   :  { %v341_v34 = vrot.slane %v304_v56, %v960_v10  ;;  %v369_v44 = vsel %vm364_vm2, %v357_v30, %v368_v37 }
  0xd9   :  { %v425_v25 = vpop.xlane.xlu1 %424 }
  0xda   :  { %v465_v19 = vrot.slane %v425_v25, %v960_v10  ;;  %v365_v2 = vsel %vm364_vm2, %v341_v34, %v363_v40 }
  0xdb   :  { %v413_v60 = vpop.xlane.xlu0 %412 }
  0xdc   :  { %v449_v31 = vrot.slane %v413_v60, %v960_v10  ;;  %v471_v35 = vsel %vm366_vm3, %v465_v19, %v470_v33 }
  0xdd   :  { %v319_v61 = vpop.xlane.xlu1 %318  ;;  %v477_v18 = vsel %vm373_vm4, %v471_v35, 0.0 }
  0xde   :  { %v468_v36 = vsel %vm366_vm3, %v449_v31, %v467_v23  ;;  %v361_v38 = vrot.slane %v319_v61, %v960_v10  ;;  %478 = vadd.xlane.f32.xlu1 %v477_v18 }
  0xdf   :  { %v307_v24 = vpop.xlane.xlu0 %306  ;;  %v474_v39 = vsel %vm373_vm4, %v468_v36, 0.0 }
  0xe0   :  { %v345_v41 = vrot.slane %v307_v24, %v960_v10  ;;  %475 = vadd.xlane.f32.xlu0 %v474_v39  ;;  %v370_v29 = vsel %vm366_vm3, %v361_v38, %v369_v44 }
  0xe1   :  { %v506_v45 = vpop.xlane.xlu1 %505  ;;  %v377_v46 = vsel %vm373_vm4, %v370_v29, 0.0 }
  0xe2   :  { %v367_v32 = vsel %vm366_vm3, %v345_v41, %v365_v2  ;;  %378 = vadd.xlane.f32.xlu1 %v377_v46  ;;  %v540_v12 = vrot.slane %v506_v45, %v960_v10 }
  0xe3   :  { %v503_v3 = vpop.xlane.xlu0 %502  ;;  %v374_v48 = vsel %vm373_vm4, %v367_v32, 0.0 }
  0xe4   :  { %375 = vadd.xlane.f32.xlu0 %v374_v48  ;;  %v536_v42 = vrot.slane %v503_v3, %v960_v10 }
  0xe5   :  { %v518_v49 = vpop.xlane.xlu1 %517 }
  0xe6   :  { %v556_v52 = vrot.slane %v518_v49, %v960_v10  ;;  %v565_v62 = vsel %vm362_vm1, %v540_v12, %v536_v42 }
  0xe7   :  { %v515_v43 = vpop.xlane.xlu0 %514 }
  0xe8   :  { %v552_v53 = vrot.slane %v515_v43, %v960_v10 }
  0xe9   :  { %v521_v50 = vpop.xlane.xlu1 %520 }
  0xea   :  { %v560_v55 = vrot.slane %v521_v50, %v960_v10  ;;  %v568_v59 = vsel %vm362_vm1, %v556_v52, %v552_v53 }
  0xeb   :  { %v509_v54 = vpop.xlane.xlu0 %508 }
  0xec   :  { %v544_v57 = vrot.slane %v509_v54, %v960_v10  ;;  %v569_v0 = vsel %vm364_vm2, %v560_v55, %v568_v59 }
  0xed   :  { %v524_v58 = vpop.xlane.xlu1 %523 }
  0xee   :  { %v564_v4 = vrot.slane %v524_v58, %v960_v10  ;;  %v566_v6 = vsel %vm364_vm2, %v544_v57, %v565_v62 }
  0xef   :  { %v512_v47 = vpop.xlane.xlu0 %511 }
  0xf0   :  { %v548_v63 = vrot.slane %v512_v47, %v960_v10  ;;  %v570_v5 = vsel %vm366_vm3, %v564_v4, %v569_v0 }
  0xf1   :  { %v576_v7 = vsel %vm373_vm4, %v570_v5, 0.0 }
  0xf2   :  { %v567_v9 = vsel %vm366_vm3, %v548_v63, %v566_v6  ;;  %577 = vadd.xlane.f32.xlu1 %v576_v7 }
  0xf3   :  { %v573_v8 = vsel %vm373_vm4, %v567_v9, 0.0 }
  0xf4   :  { %574 = vadd.xlane.f32.xlu0 %v573_v8 }
 0x16b   :  { %v479_v51 = vpop.xlane.xlu1 %478 }
 0x16c   :  { %v489_v11 = vrot.slane %v479_v51, %v960_v10 }
 0x16d   :  { %v476_v13 = vpop.xlane.xlu0 %475 }
 0x16e   :  { %v485_v1 = vrot.slane %v476_v13, %v960_v10 }
 0x16f   :  { %v379_v56 = vpop.xlane.xlu1 %378 }
 0x170   :  { %v490_v15 = vsel %vm362_vm1, %v489_v11, %v485_v1  ;;  %v389_v16 = vrot.slane %v379_v56, %v960_v10 }
 0x171   :  { %v376_v20 = vpop.xlane.xlu0 %375  ;;  %492 = vst.msk [vmem:[#allocation11] sm:$0x3] %vm392_vm5, %v490_v15 }
 0x172   :  { %v385_v21 = vrot.slane %v376_v20, %v960_v10 }
 0x173   :  { %729 = shalt.err (!%p726_p6)
}
 0x174   :  { %s730_s20 = scalar_lea.hbm %s1061_s3, 32 }
 0x175   :  { %p731_p7 = scmp.ne.s32.totalorder %s1061_s3, %s730_s20  ;;  %p734_p8 = scmp.lt.u32.totalorder %s730_s20, %s1061_s3 }
 0x177   :  { %p736_p9 = pnand %p734_p8, %p731_p7 }
 0x179   :  { %739 = shalt.err (!%p736_p9)
}
 0x17a   :  { %611 = dma.vmem_to_hbm [thread:$0]  %s609_s14, 32, %s1061_s3, [#allocation12]   ;;  %v390_v14 = vsel %vm362_vm1, %v389_v16, %v385_v21 }
 0x17b   :  { %393 = vst.msk [vmem:[#allocation10] sm:$0x3] %vm392_vm5, %v390_v14  ;;  %s740_s27 = scalar_lea.vmem %s599_s16, 32  ;;  %p745_p11 = scmp.lt.s32.totalorder %s599_s16, %s599_s16 }
 0x17c   :  { %p741_p10 = scmp.ne.s32.totalorder %s599_s16, %s740_s27  ;;  %p746_p12 = scmp.lt.s32.totalorder %s740_s27, %s740_s27 }
 0x17e   :  { %p747_p13 = por %p746_p12, %p745_p11 }
 0x180   :  { %p748_p0 = pnand %p747_p13, %p741_p10 }
 0x182   :  { %751 = shalt.err (!%p748_p0)
}
 0x183   :  { %s752_s30 = scalar_lea.hbm %s1060_s2, 32 }
 0x184   :  { %p753_p1 = scmp.ne.s32.totalorder %s1060_s2, %s752_s30  ;;  %p756_p2 = scmp.lt.u32.totalorder %s752_s30, %s1060_s2 }
 0x186   :  { %p758_p3 = pnand %p756_p2, %p753_p1 }
 0x188   :  { %761 = shalt.err (!%p758_p3)
}
 0x189   :  { %601 = dma.vmem_to_hbm [thread:$0]  %s599_s16, 32, %s1060_s2, [#allocation7]   ;;  %v578_v22 = vpop.xlane.xlu1 %577  ;;  %v575_v17 = vpop.xlane.xlu0 %574 }
 0x18a   :  { %s798_s10 = smov [#allocation13]   ;;  %v588_v25 = vrot.slane %v578_v22, %v960_v10  ;;  %v584_v26 = vrot.slane %v575_v17, %v960_v10 }
 0x18b   :  { %s618_s11 = sshll.u32 %s798_s10, 4  ;;  %s619_s11 = int_to_ptr.vmem [resolvable:$true] %s618_s11 }
 0x18c   :  { %v589_v27 = vsel %vm362_vm1, %v588_v25, %v584_v26  ;;  %s762_s12 = scalar_lea.vmem %s619_s11, 32  ;;  %p767_p5 = scmp.lt.s32.totalorder %s619_s11, %s619_s11 }
 0x18d   :  { %591 = vst.msk [vmem:[#allocation13] sm:$0x3] %vm392_vm5, %v589_v27  ;;  %p763_p4 = scmp.ne.s32.totalorder %s619_s11, %s762_s12  ;;  %p768_p6 = scmp.lt.s32.totalorder %s762_s12, %s762_s12 }
 0x18f   :  { %p769_p7 = por %p768_p6, %p767_p5 }
 0x191   :  { %p770_p8 = pnand %p769_p7, %p763_p4 }
 0x193   :  { %773 = shalt.err (!%p770_p8)
}
 0x194   :  { %s774_s13 = scalar_lea.hbm %s1062_s4, 32 }
 0x195   :  { %p775_p9 = scmp.ne.s32.totalorder %s1062_s4, %s774_s13  ;;  %p778_p10 = scmp.lt.u32.totalorder %s774_s13, %s1062_s4 }
 0x197   :  { %p780_p11 = pnand %p778_p10, %p775_p9 }
 0x199   :  { %783 = shalt.err (!%p780_p11)
}
 0x19a   :  { %621 = dma.vmem_to_hbm [thread:$0]  %s619_s11, 32, %s1062_s4, [#allocation12]  }
 0x19b   :  { %788 = dma.done.wait [#allocation7], 32  }
 0x19c   :  { %789 = vsyncadd [#allocation7], 4294967264 }
 0x19d   :  { %790 = dma.done.wait [#allocation12], 64  }
 0x19e   :  { %791 = vsyncadd [#allocation12], 4294967232 }
 0x19f   :  { %631 = vsyncpa [#allocation6], 1 }
 0x1a0   :  { %632 = vsyncpa [#allocation9], 1 }
 0x1a1   :  { %633 = vsyncpa [#allocation7], 1 }
 0x1a2   :  { %634 = vsyncpa [#allocation12], 1 }

</bundles_post_ra>
